<compile_context>
chip_gen: v5e
topology: v5e:2x2
jax: 0.10.0
libtpu: 0.0.40
codegen_flags: <defaults>
</compile_context>

<pallas_src>
import jax
import jax.numpy as jnp
from jax.experimental import pallas as pl
from jax.experimental.pallas import tpu as pltpu


def _round_up(a, m):
    return ((a + m - 1) // m) * m


def _sublane_align(dtype):
    # Native sublane packing: 8 rows for 4-byte, 16 for 2-byte, 32 for 1-byte.
    return {4: 8, 2: 16, 1: 32}.get(jnp.dtype(dtype).itemsize, 8)


def _choose_tile(dim, align, cap):
    """Tile size (multiple of `align`, <= cap) minimizing padding waste,
    preferring larger tiles (fewer grid steps) on ties."""
    dim_r = _round_up(max(int(dim), 1), align)
    if dim_r <= cap:
        return dim_r
    best_t, best_key = align, None
    t = align
    while t <= cap:
        padded = _round_up(dim, t)
        key = (padded - dim, padded // t)  # (waste, grid steps)
        if best_key is None or key < best_key:
            best_key, best_t = key, t
        t += align
    return best_t


def _tile_footprint_bytes(tm, tn, tk, itemsize):
    # x & W^T tiles double-buffered + bias tile + out tile (double-buffered)
    # + f32 accumulator scratch.
    return (2 * tm * tk + 2 * tk * tn + 2 * tn + 2 * tm * tn) * itemsize + tm * tn * 4


def _vmem_tile_budget_bytes():
    # Conservative per-call tile budget that is safe across v5e/v6e/v7x.
    try:
        info = pltpu.get_tpu_info()
        cap = getattr(info, "vmem_capacity_bytes", None)
        if cap:
            return int(min(cap // 3, 24 * 1024 * 1024))
    except Exception:
        pass
    return 12 * 1024 * 1024


def prepare_linear_params(w, b, *, tm_cap=512, tn_cap=512, tk_cap=1024):
    """One-time parameter prep (hoisted out of forward): transpose W to
    (in_dim, out_dim) and pad W/b to the chosen tile multiples."""
    out_dim, in_dim = w.shape
    itemsize = jnp.dtype(w.dtype).itemsize

    tn = _choose_tile(out_dim, 128, tn_cap)
    tk = _choose_tile(in_dim, 128, tk_cap)

    # Keep the worst-case (tm = tm_cap) double-buffered footprint within budget.
    budget = _vmem_tile_budget_bytes()
    while _tile_footprint_bytes(tm_cap, tn, tk, itemsize) > budget and tk > 128:
        tk = max(128, _round_up(tk // 2, 128))
    while _tile_footprint_bytes(tm_cap, tn, tk, itemsize) > budget and tn > 128:
        tn = max(128, _round_up(tn // 2, 128))

    np_ = _round_up(out_dim, tn)
    kp = _round_up(in_dim, tk)

    wt = w.T  # (in_dim, out_dim) -- done once, not per forward call.
    if (kp, np_) != (in_dim, out_dim):
        wt = jnp.pad(wt, ((0, kp - in_dim), (0, np_ - out_dim)))
    bp = b.reshape(1, out_dim)
    if np_ != out_dim:
        bp = jnp.pad(bp, ((0, 0), (0, np_ - out_dim)))

    return {
        "wt": wt,           # (kp, np_)
        "b": bp,            # (1, np_)
        "in_dim": in_dim,
        "out_dim": out_dim,
        "tn": tn,
        "tk": tk,
        "tm_cap": tm_cap,
    }


def _linear_kernel(x_ref, wt_ref, b_ref, o_ref, acc_ref):
    # grid = (M-tiles, N-tiles, K-tiles); K (reduction) is the last grid axis.
    k = pl.program_id(2)

    @pl.when(k == 0)
    def _init():
        acc_ref[...] = jnp.zeros_like(acc_ref)

    acc_ref[...] += jnp.dot(
        x_ref[...], wt_ref[...], preferred_element_type=jnp.float32
    )

    @pl.when(k == pl.num_programs(2) - 1)
    def _epilogue():
        o_ref[...] = (acc_ref[...] + b_ref[...].astype(jnp.float32)).astype(o_ref.dtype)


def _linear_kernel_single_k(x_ref, wt_ref, b_ref, o_ref):
    # Reduction fits one tile: write straight to the output, no scratch pass.
    acc = jnp.dot(x_ref[...], wt_ref[...], preferred_element_type=jnp.float32)
    o_ref[...] = (acc + b_ref[...].astype(jnp.float32)).astype(o_ref.dtype)


def linear_forward(x, params):
    """model01.forward: y = x @ w.T + b (PyTorch nn.Linear convention)."""
    B, in_dim = x.shape
    assert in_dim == params["in_dim"]
    out_dim = params["out_dim"]
    wt, bp = params["wt"], params["b"]
    tn, tk = params["tn"], params["tk"]
    kp, np_ = wt.shape

    sub = _sublane_align(x.dtype)
    tm = _choose_tile(B, sub, params["tm_cap"])
    mp = _round_up(B, tm)

    # v7x megacore: if the M axis collapses to one tile, split N into >=2
    # blocks so both TensorCores get work (no-op / harmless on v5e, v6e).
    if mp // tm == 1 and np_ // tn == 1 and np_ % 256 == 0:
        tn = np_ // 2

    # Pad x only when needed (aligned shapes pay nothing).
    if (mp, kp) != (B, in_dim):
        x_in = jnp.pad(x, ((0, mp - B), (0, kp - in_dim)))
    else:
        x_in = x

    grid_m, grid_n, grid_k = mp // tm, np_ // tn, kp // tk
    itemsize = jnp.dtype(x.dtype).itemsize
    footprint = _tile_footprint_bytes(tm, tn, tk, itemsize)
    vmem_limit = int(min(30 * 1024 * 1024, max(16 * 1024 * 1024, footprint + (6 << 20))))

    cost = pl.CostEstimate(
        flops=2 * mp * np_ * kp,
        bytes_accessed=(mp * kp + kp * np_ + np_ + mp * np_) * itemsize,
        transcendentals=0,
    )

    if grid_k == 1:
        yp = pl.pallas_call(
            _linear_kernel_single_k,
            out_shape=jax.ShapeDtypeStruct((mp, np_), x.dtype),
            grid=(grid_m, grid_n),
            in_specs=[
                pl.BlockSpec((tm, tk), lambda i, j: (i, 0)),   # x tile
                pl.BlockSpec((tk, tn), lambda i, j: (0, j)),   # W^T tile
                pl.BlockSpec((1, tn), lambda i, j: (0, j)),    # bias tile
            ],
            out_specs=pl.BlockSpec((tm, tn), lambda i, j: (i, j)),
            compiler_params=pltpu.CompilerParams(
                dimension_semantics=("parallel", "parallel"),
                vmem_limit_bytes=vmem_limit,
            ),
            cost_estimate=cost,
        )(x_in, wt, bp)
    else:
        yp = pl.pallas_call(
            _linear_kernel,
            out_shape=jax.ShapeDtypeStruct((mp, np_), x.dtype),
            grid=(grid_m, grid_n, grid_k),
            in_specs=[
                pl.BlockSpec((tm, tk), lambda i, j, k: (i, k)),   # x tile
                pl.BlockSpec((tk, tn), lambda i, j, k: (k, j)),   # W^T tile
                pl.BlockSpec((1, tn), lambda i, j, k: (0, j)),    # bias tile
            ],
            out_specs=pl.BlockSpec((tm, tn), lambda i, j, k: (i, j)),
            scratch_shapes=[pltpu.VMEM((tm, tn), jnp.float32)],
            compiler_params=pltpu.CompilerParams(
                dimension_semantics=("parallel", "parallel", "arbitrary"),
                vmem_limit_bytes=vmem_limit,
            ),
            cost_estimate=cost,
        )(x_in, wt, bp)

    if (mp, np_) != (B, out_dim):
        return yp[:B, :out_dim]
    return yp


def init_params(key, in_dim, out_dim, dtype=jnp.float32):
    # Deterministic init mirroring nn.Linear's uniform(-1/sqrt(in), 1/sqrt(in)).
    kw, kb = jax.random.split(key)
    bound = 1.0 / (in_dim ** 0.5)
    w = jax.random.uniform(kw, (out_dim, in_dim), dtype, minval=-bound, maxval=bound)
    b = jax.random.uniform(kb, (out_dim,), dtype, minval=-bound, maxval=bound)
    return w, b


if __name__ == "__main__":
    key = jax.random.PRNGKey(0)
    kx, kp, kx2, kp2 = jax.random.split(key, 4)

    # 1) Small demo shapes consistent with the module (single-K fast path).
    B, in_dim, out_dim = 8, 32, 16
    x = jax.random.normal(kx, (B, in_dim), jnp.float32)
    w, b = init_params(kp, in_dim, out_dim)
    params = prepare_linear_params(w, b)   # one-time transpose + pad, hoisted
    y = jax.block_until_ready(linear_forward(x, params))
    y_ref = x @ w.T + b
    assert y.shape == (B, out_dim)
    assert jnp.allclose(y, y_ref, atol=1e-5, rtol=1e-5)

    # 2) Slightly larger shapes to exercise the multi-K accumulator path and
    #    the megacore N-split branch.
    B2, in2, out2 = 64, 1536, 256
    x2 = jax.random.normal(kx2, (B2, in2), jnp.float32)
    w2, b2 = init_params(kp2, in2, out2)
    params2 = prepare_linear_params(w2, b2)
    y2 = jax.block_until_ready(linear_forward(x2, params2))
    y2_ref = x2 @ w2.T + b2
    assert y2.shape == (B2, out2)
    assert jnp.allclose(y2, y2_ref, atol=2e-3, rtol=2e-3)

    print("KERNEL_OK")
</pallas_src>

<mosaic_0001>
module attributes {stable_mosaic.version = 11 : i64} {
  func.func @_linear_kernel_single_k(%arg0: i32, %arg1: i32, %arg2: memref<8x128xf32, #tpu.memory_space<vmem>>, %arg3: memref<128x128xf32, #tpu.memory_space<vmem>>, %arg4: memref<1x128xf32, #tpu.memory_space<vmem>>, %arg5: memref<8x128xf32, #tpu.memory_space<vmem>>) attributes {dimension_semantics = [#tpu.dimension_semantics<parallel>, #tpu.dimension_semantics<parallel>], iteration_bounds = array<i64: 1, 1>, scalar_prefetch = 0 : i64, scratch_operands = 0 : i64, tpu.core_type = #tpu.core_type<tc>, window_params = [{transform_indices = @transform_0, window_bounds = array<i64: 8, 128>}, {transform_indices = @transform_1, window_bounds = array<i64: 128, 128>}, {transform_indices = @transform_2, window_bounds = array<i64: 1, 128>}, {transform_indices = @transform_3, window_bounds = array<i64: 8, 128>}]} {
    %c0 = arith.constant 0 : index
    %c0_0 = arith.constant 0 : index
    %0 = vector.load %arg2[%c0, %c0_0] : memref<8x128xf32, #tpu.memory_space<vmem>>, vector<8x128xf32>
    %c0_1 = arith.constant 0 : index
    %c0_2 = arith.constant 0 : index
    %1 = vector.load %arg3[%c0_1, %c0_2] : memref<128x128xf32, #tpu.memory_space<vmem>>, vector<128x128xf32>
    %cst = arith.constant dense<0.000000e+00> : vector<8x128xf32>
    %2 = tpu.matmul %0, %1, %cst {dimension_numbers = #tpu.dot_dimension_numbers<[1], [0], [0], [1], [0, 0, 1, 1], [], []>} : vector<8x128xf32>, vector<128x128xf32>, vector<8x128xf32> -> vector<8x128xf32>
    %c0_3 = arith.constant 0 : index
    %c0_4 = arith.constant 0 : index
    %3 = vector.load %arg4[%c0_3, %c0_4] : memref<1x128xf32, #tpu.memory_space<vmem>>, vector<1x128xf32>
    %4 = vector.broadcast %3 : vector<1x128xf32> to vector<8x128xf32>
    %5 = arith.addf %2, %4 : vector<8x128xf32>
    %c0_5 = arith.constant 0 : index
    %c0_6 = arith.constant 0 : index
    %6 = vector.load %arg5[%c0_5, %c0_6] : memref<8x128xf32, #tpu.memory_space<vmem>>, vector<8x128xf32>
    tpu.vector_store %arg5[%c0_5, %c0_6], %5 {strides = array<i32>} : memref<8x128xf32, #tpu.memory_space<vmem>>, vector<8x128xf32>,
    return
  }
  func.func @transform_0(%arg0: i32, %arg1: i32) -> (i32, i32) {
    %c0_i32 = arith.constant 0 : i32
    %c0_i32_0 = arith.constant 0 : i32
    return %arg0, %c0_i32 : i32, i32
  }
  func.func @transform_1(%arg0: i32, %arg1: i32) -> (i32, i32) {
    %c0_i32 = arith.constant 0 : i32
    %c0_i32_0 = arith.constant 0 : i32
    return %c0_i32, %arg1 : i32, i32
  }
  func.func @transform_2(%arg0: i32, %arg1: i32) -> (i32, i32) {
    %c0_i32 = arith.constant 0 : i32
    %c0_i32_0 = arith.constant 0 : i32
    return %c0_i32, %arg1 : i32, i32
  }
  func.func @transform_3(%arg0: i32, %arg1: i32) -> (i32, i32) {
    %c0_i32 = arith.constant 0 : i32
    return %arg0, %arg1 : i32, i32
  }
}

</mosaic_0001>

<bundles_post_ra>
// kernel: tpu_custom_call.1
= control target key start
LH: loop header
LB: loop body
LE: loop exit
PB: predicated region body
PF: predicated region fallthrough
CT: control target
= control target key end

     0   :  { %8 = vsyncpa [#allocation3], 0  ;;  %s226_s0 = inlined_call_operand.hbm [shape: f32[8,128], index: 0, kind: input, shape index: {}]   ;;  %s227_s1 = inlined_call_operand.hbm [shape: f32[128,128], index: 1, kind: input, shape index: {}]   ;;  %s228_s2 = inlined_call_operand.vmem [shape: f32[1,128], index: 2, kind: input, shape index: {}]   ;;  %s229_s3 = inlined_call_operand.hbm [shape: f32[8,128], index: 3, kind: output, shape index: {}]  }
   0x1   :  { %9 = vsyncpa [#allocation6], 0 }
   0x2   :  { %10 = vsyncpa [#allocation4], 0  ;;  %s16_s14 = sshll.u32 %s226_s0, 4  ;;  %s189_s15 = smov [#allocation2]   ;;  %s17_s14 = int_to_ptr.hbm [resolvable:$true] %s16_s14 }
   0x3   :  { %s18_s16 = sshll.u32 %s189_s15, 4  ;;  %s26_s19 = sshll.u32 %s227_s1, 4  ;;  %s19_s16 = int_to_ptr.vmem [resolvable:$true] %s18_s16  ;;  %s27_s19 = int_to_ptr.hbm [resolvable:$true] %s26_s19 }
   0x4   :  { %21 = dma.hbm_to_vmem [thread:$0]  %s17_s14, 128, %s19_s16, [#allocation3]  }
   0x5   :  { %s190_s20 = smov [#allocation5]   ;;  %s191_s22 = smov 128  }
   0x6   :  { %s28_s21 = sshll.u32 %s190_s20, 4  ;;  %s192_s23 = smov 8   ;;  %s29_s21 = int_to_ptr.vmem [resolvable:$true] %s28_s21 }
   0x7   :  { %34 = dma.hbm_to_vmem [thread:$0]  %s27_s19, 2048, %s29_s21, [#allocation6], %s191_s22, %s191_s22, %s192_s23  }
   0x8   :  { %183 = dma.done.wait [#allocation3], 128  }
   0x9   :  { %184 = vsyncadd [#allocation3], 4294967168 }
   0xa   :  { %185 = dma.done.wait [#allocation6], 2048  }
   0xb   :  { %186 = vsyncadd [#allocation6], 4294965248  ;;  %v61_v0 = vld [vmem:[#allocation5 + $0x78] sm:$0xff]  ;;  %v60_v1 = vld [vmem:[#allocation5 + $0x70] sm:$0xff]  ;;  %s193_s24 = smov [#allocation7]   ;;  %s94_s28 = sshll.u32 %s229_s3, 4  ;;  %s95_s28 = int_to_ptr.hbm [resolvable:$true] %s94_s28 }
   0xc   :  { %66 = vmatpush.msra.mxu0 %v61_v0  ;;  %v59_v2 = vld [vmem:[#allocation5 + $0x68] sm:$0xff]  ;;  %v58_v3 = vld [vmem:[#allocation5 + $0x60] sm:$0xff]  ;;  %v57_v4 = vld [vmem:[#allocation5 + $0x58] sm:$0xff]  ;;  %s92_s25 = sshll.u32 %s193_s24, 4  ;;  %s93_s25 = int_to_ptr.vmem [resolvable:$true] %s92_s25 }
   0xd   :  { %v56_v5 = vld [vmem:[#allocation5 + $0x50] sm:$0xff]  ;;  %v55_v6 = vld [vmem:[#allocation5 + $0x48] sm:$0xff]  ;;  %v54_v7 = vld [vmem:[#allocation5 + $0x40] sm:$0xff] }
   0xe   :  { %67 = vmatpush.msra.mxu0 %v60_v1  ;;  %v53_v8 = vld [vmem:[#allocation5 + $0x38] sm:$0xff]  ;;  %v52_v9 = vld [vmem:[#allocation5 + $0x30] sm:$0xff]  ;;  %v51_v10 = vld [vmem:[#allocation5 + $0x28] sm:$0xff] }
   0xf   :  { %v50_v11 = vld [vmem:[#allocation5 + $0x20] sm:$0xff]  ;;  %v49_v12 = vld [vmem:[#allocation5 + $0x18] sm:$0xff]  ;;  %v48_v13 = vld [vmem:[#allocation5 + $0x10] sm:$0xff] }
  0x10   :  { %68 = vmatpush.msra.mxu0 %v59_v2  ;;  %v47_v14 = vld [vmem:[#allocation5 + $0x8] sm:$0xff]  ;;  %v46_v15 = vld [vmem:[#allocation5] sm:$0xff]  ;;  %v45_v16 = vld [vmem:[#allocation2] sm:$0xff] }
  0x11   :  { %v110_v17 = vld [vmem:[%s228_s2] ss:$0 sm:$0xff] }
  0x12   :  { %69 = vmatpush.msra.mxu0 %v58_v3 }
  0x14   :  { %70 = vmatpush.msra.mxu0 %v57_v4 }
  0x16   :  { %71 = vmatpush.msra.mxu0 %v56_v5 }
  0x18   :  { %72 = vmatpush.msra.mxu0 %v55_v6 }
  0x1a   :  { %73 = vmatpush.msra.mxu0 %v54_v7 }
  0x1c   :  { %74 = vmatpush.msra.mxu0 %v53_v8 }
  0x1e   :  { %75 = vmatpush.msra.mxu0 %v52_v9 }
  0x20   :  { %76 = vmatpush.msra.mxu0 %v51_v10 }
  0x22   :  { %77 = vmatpush.msra.mxu0 %v50_v11 }
  0x24   :  { %78 = vmatpush.msra.mxu0 %v49_v12 }
  0x26   :  { %79 = vmatpush.msra.mxu0 %v48_v13 }
  0x28   :  { %80 = vmatpush.msra.mxu0 %v47_v14 }
  0x2a   :  { %81 = vmatpush.msra.mxu0 %v46_v15 }
  0x2b   :  { %82 = vmatmul.f32.vlgmr.msra.gmra.mxu0 %v45_v16 }
  0xa8   :  { %v83_v18 = vpop.f32.mrf.mxu0 }
  0xa9   :  { %v84_v19 = vadd.f32 %v110_v17, %v83_v18 }
  0xab   :  { %86 = vst [vmem:[#allocation7] sm:$0xff] %v84_v19 }
  0xac   :  { %97 = dma.vmem_to_hbm [thread:$0]  %s93_s25, 128, %s95_s28, [#allocation4]  }
  0xad   :  { %187 = dma.done.wait [#allocation4], 128  }
  0xae   :  { %188 = vsyncadd [#allocation4], 4294967168 }
  0xaf   :  { %102 = vsyncpa [#allocation3], 1 }
  0xb0   :  { %103 = vsyncpa [#allocation6], 1 }
  0xb1   :  { %104 = vsyncpa [#allocation4], 1 }

</bundles_post_ra>
